<compile_context>
chip_gen: v7x
topology: tpu7x:2x2x1
jax: 0.10.0
libtpu: 0.0.40
codegen_flags: <defaults>
</compile_context>

<pallas_src>
import functools

import jax
import jax.numpy as jnp
from jax import lax
from jax.experimental import pallas as pl
from jax.experimental.pallas import tpu as pltpu

LRELU_SLOPE = 0.2
BN_EPS = 1e-5


def _round_up(x, m):
    return (x + m - 1) // m * m


# ---------------------------------------------------------------------------
# Pallas kernels
# ---------------------------------------------------------------------------
def _conv_matmul_kernel(p_ref, w_ref, *rest, act, want_stats):
    """K-tiled im2col matmul, fused activation + optional per-tile BN-stat partials."""
    if want_stats:
        o_ref, stat_ref, acc_ref = rest
    else:
        o_ref, acc_ref = rest

    k = pl.program_id(1)

    @pl.when(k == 0)
    def _():
        acc_ref[...] = jnp.zeros_like(acc_ref)

    acc_ref[...] += jnp.dot(p_ref[...], w_ref[...],
                            preferred_element_type=jnp.float32)

    @pl.when(k == pl.num_programs(1) - 1)
    def _():
        y = acc_ref[...]
        if want_stats:
            # Per-tile partial sums of the *pre-activation* conv output (BN input).
            # Row 0 = sum, row 1 = sum of squares, rows 2..7 = zero padding so the
            # stat block stays (8, Cout_pad) (sublane/lane aligned).
            s = jnp.sum(y, axis=0, keepdims=True)
            q = jnp.sum(y * y, axis=0, keepdims=True)
            row = lax.broadcasted_iota(jnp.int32, (8, 1), 0)
            stat_ref[...] = jnp.where(row == 0, s, jnp.where(row == 1, q, 0.0))
        if act == "lrelu":
            y = jnp.where(y >= 0, y, LRELU_SLOPE * y)
        elif act == "sigmoid":
            y = jax.nn.sigmoid(y)
        o_ref[...] = y.astype(o_ref.dtype)


def _bn_lrelu_kernel(x_ref, scale_ref, shift_ref, o_ref):
    """Elementwise BatchNorm affine (folded scale/shift) + LeakyReLU(0.2), bf16 out."""
    y = x_ref[...] * scale_ref[...] + shift_ref[...]
    o_ref[...] = jnp.where(y >= 0, y, LRELU_SLOPE * y).astype(o_ref.dtype)


# ---------------------------------------------------------------------------
# Pallas wrappers
# ---------------------------------------------------------------------------
def _tiles(m, k):
    tm = 512 if m >= 512 else _round_up(m, 8)
    m_pad = _round_up(m, tm)
    tk = 512 if k >= 512 else _round_up(k, 128)
    k_pad = _round_up(k, tk)
    return tm, m_pad, tk, k_pad


def _pallas_conv(patches, w_mat, *, act, want_stats, out_dtype):
    m, k = patches.shape
    cout = w_mat.shape[1]
    tm, m_pad, tk, k_pad = _tiles(m, k)
    cout_pad = _round_up(cout, 128)

    p = jnp.pad(patches, ((0, m_pad - m), (0, k_pad - k))).astype(jnp.bfloat16)
    w = jnp.pad(w_mat, ((0, k_pad - k), (0, cout_pad - cout))).astype(jnp.bfloat16)

    nm, nk = m_pad // tm, k_pad // tk

    out_shape = [jax.ShapeDtypeStruct((m_pad, cout_pad), out_dtype)]
    out_specs = [pl.BlockSpec((tm, cout_pad), lambda i, kk: (i, 0))]
    scratch_shapes = [pltpu.VMEM((tm, cout_pad), jnp.float32)]
    if want_stats:
        out_shape.append(jax.ShapeDtypeStruct((nm * 8, cout_pad), jnp.float32))
        out_specs.append(pl.BlockSpec((8, cout_pad), lambda i, kk: (i, 0)))

    res = pl.pallas_call(
        functools.partial(_conv_matmul_kernel, act=act, want_stats=want_stats),
        out_shape=out_shape,
        grid_spec=pltpu.PrefetchScalarGridSpec(
            num_scalar_prefetch=0,
            grid=(nm, nk),
            in_specs=[
                pl.BlockSpec((tm, tk), lambda i, kk: (i, kk)),
                pl.BlockSpec((tk, cout_pad), lambda i, kk: (kk, 0)),
            ],
            out_specs=out_specs,
            scratch_shapes=scratch_shapes,
        ),
        compiler_params=pltpu.CompilerParams(
            dimension_semantics=("parallel", "arbitrary")),
    )(p, w)

    if want_stats:
        y, stats = res[0], res[1]
        return y, stats.reshape(nm, 8, cout_pad)
    return res[0]


def _pallas_bn_lrelu(x, scale, shift, out_dtype=jnp.bfloat16):
    m_pad, c_pad = x.shape
    tm = 512 if m_pad >= 512 else m_pad  # m_pad is a multiple of the conv tm
    return pl.pallas_call(
        _bn_lrelu_kernel,
        out_shape=jax.ShapeDtypeStruct((m_pad, c_pad), out_dtype),
        grid_spec=pltpu.PrefetchScalarGridSpec(
            num_scalar_prefetch=0,
            grid=(m_pad // tm,),
            in_specs=[
                pl.BlockSpec((tm, c_pad), lambda i: (i, 0)),
                pl.BlockSpec((1, c_pad), lambda i: (0, 0)),
                pl.BlockSpec((1, c_pad), lambda i: (0, 0)),
            ],
            out_specs=pl.BlockSpec((tm, c_pad), lambda i: (i, 0)),
        ),
        compiler_params=pltpu.CompilerParams(
            dimension_semantics=("parallel",)),
    )(x, scale, shift)


# ---------------------------------------------------------------------------
# Plain-JAX glue: im2col, parameters, full forward
# ---------------------------------------------------------------------------
def _im2col(x_nhwc, kh, kw, stride, pad):
    n, h, w, c = x_nhwc.shape
    if pad:
        x_nhwc = jnp.pad(x_nhwc, ((0, 0), (pad, pad), (pad, pad), (0, 0)))
    oh = (h + 2 * pad - kh) // stride + 1
    ow = (w + 2 * pad - kw) // stride + 1
    cols = []
    for i in range(kh):
        for j in range(kw):
            cols.append(
                x_nhwc[:, i:i + stride * oh:stride, j:j + stride * ow:stride, :]
            )
    patches = jnp.stack(cols, axis=3)  # [N, OH, OW, KH*KW, C]
    return patches.reshape(n * oh * ow, kh * kw * c), (n, oh, ow)


def init_params(key, nc, ndf):
    cfg = [
        # (cin, cout, stride, pad, act, has_bn)
        (nc,      ndf,     2, 1, "lrelu",   False),
        (ndf,     ndf * 2, 2, 1, "lrelu",   True),
        (ndf * 2, ndf * 4, 2, 1, "lrelu",   True),
        (ndf * 4, ndf * 8, 2, 1, "lrelu",   True),
        (ndf * 8, ndf * 8, 2, 1, "lrelu",   True),
        (ndf * 8, 1,       1, 0, "sigmoid", False),
    ]
    params = []
    for li, (cin, cout, s, p, act, bn) in enumerate(cfg):
        kw_, kg, kb = jax.random.split(jax.random.fold_in(key, li), 3)
        w = 0.1 * jax.random.normal(kw_, (cout, cin, 4, 4), jnp.float32)
        gamma = (1.0 + 0.1 * jax.random.normal(kg, (cout,), jnp.float32)) if bn else None
        beta = (0.1 * jax.random.normal(kb, (cout,), jnp.float32)) if bn else None
        params.append(
            dict(w=w, gamma=gamma, beta=beta, stride=s, pad=p, act=act, bn=bn)
        )
    return params


def netgloballD_forward(x_nchw, params):
    x = jnp.transpose(x_nchw, (0, 2, 3, 1)).astype(jnp.bfloat16)  # -> NHWC, bf16
    for p in params:
        cout = p["w"].shape[0]
        cout_pad = _round_up(cout, 128)
        patches, (n, oh, ow) = _im2col(x, 4, 4, p["stride"], p["pad"])
        m = patches.shape[0]
        # weight [Cout, Cin, KH, KW] -> [(kh*KW+kw)*Cin + cin, Cout] to match patches
        w_mat = jnp.transpose(p["w"], (2, 3, 1, 0)).reshape(-1, cout)
        if p["bn"]:
            y, stats = _pallas_conv(patches, w_mat, act="none",
                                    want_stats=True, out_dtype=jnp.float32)
            s = jnp.sum(stats[:, 0, :], axis=0)
            q = jnp.sum(stats[:, 1, :], axis=0)
            mf = jnp.float32(m)
            mean = s / mf
            var = q / mf - mean * mean            # biased variance (training-mode BN)
            gamma = jnp.pad(p["gamma"], (0, cout_pad - cout))
            beta = jnp.pad(p["beta"], (0, cout_pad - cout))
            scale = gamma / jnp.sqrt(var + BN_EPS)
            shift = beta - mean * scale
            y = _pallas_bn_lrelu(y, scale[None, :].astype(jnp.float32),
                                 shift[None, :].astype(jnp.float32))
        else:
            out_dtype = jnp.bfloat16 if p["act"] == "lrelu" else jnp.float32
            y = _pallas_conv(patches, w_mat, act=p["act"],
                             want_stats=False, out_dtype=out_dtype)
        x = y[:m, :cout].reshape(n, oh, ow, cout)
    return x.astype(jnp.float32).reshape(-1, 1)  # matches `output.view(-1, 1)`


# ---------------------------------------------------------------------------
# Pure-JAX reference (for correctness check)
# ---------------------------------------------------------------------------
def _ref_forward(x_nchw, params):
    x = x_nchw.astype(jnp.float32)
    for p in params:
        y = lax.conv_general_dilated(
            x, p["w"],
            window_strides=(p["stride"], p["stride"]),
            padding=((p["pad"], p["pad"]), (p["pad"], p["pad"])),
            dimension_numbers=("NCHW", "OIHW", "NCHW"),
        )
        if p["bn"]:
            mean = jnp.mean(y, axis=(0, 2, 3), keepdims=True)
            var = jnp.var(y, axis=(0, 2, 3), keepdims=True)  # biased
            g = p["gamma"][None, :, None, None]
            b = p["beta"][None, :, None, None]
            y = g * (y - mean) / jnp.sqrt(var + BN_EPS) + b
        if p["act"] == "lrelu":
            y = jnp.where(y >= 0, y, LRELU_SLOPE * y)
        elif p["act"] == "sigmoid":
            y = jax.nn.sigmoid(y)
        x = y
    return x.reshape(-1, 1)


if __name__ == "__main__":
    # Smallest spatial size the architecture supports (5x stride-2 + final 4x4 conv)
    batch, nc, ndf, size = 2, 3, 8, 128
    key = jax.random.PRNGKey(0)
    params = init_params(key, nc, ndf)
    x = jax.random.normal(jax.random.fold_in(key, 1234), (batch, nc, size, size),
                          jnp.float32)

    out = jax.block_until_ready(netgloballD_forward(x, params))
    assert out.shape == (batch, 1), out.shape

    ref = _ref_forward(x, params)
    max_err = float(jnp.max(jnp.abs(out - ref)))
    # bf16 MXU inputs vs f32 reference -> slightly relaxed tolerance.
    assert max_err < 5e-2, f"mismatch vs reference: max_err={max_err}"
    print("KERNEL_OK")
</pallas_src>

<mosaic_0001>
module attributes {stable_mosaic.version = 11 : i64} {
  func.func @_conv_matmul_kernel(%arg0: i32, %arg1: i32, %arg2: memref<512x128xbf16, #tpu.memory_space<vmem>>, %arg3: memref<128x128xbf16, #tpu.memory_space<vmem>>, %arg4: memref<512x128xbf16, #tpu.memory_space<vmem>>, %arg5: memref<512x128xf32, #tpu.memory_space<vmem>>) attributes {dimension_semantics = [#tpu.dimension_semantics<parallel>, #tpu.dimension_semantics<arbitrary>], iteration_bounds = array<i64: 16, 1>, scalar_prefetch = 0 : i64, scratch_operands = 1 : i64, tpu.core_type = #tpu.core_type<tc>, window_params = [{transform_indices = @transform_0, window_bounds = array<i64: 512, 128>}, {transform_indices = @transform_1, window_bounds = array<i64: 128, 128>}, {transform_indices = @transform_2, window_bounds = array<i64: 512, 128>}]} {
    %c0_i32 = arith.constant 0 : i32
    %0 = arith.cmpi eq, %arg1, %c0_i32 : i32
    %1 = arith.extui %0 : i1 to i32
    %c0_i32_0 = arith.constant 0 : i32
    %2 = arith.cmpi ne, %1, %c0_i32_0 : i32
    scf.if %2 {
      %cst_10 = arith.constant 0.000000e+00 : f32
      %12 = vector.broadcast %cst_10 : f32 to vector<512x128xf32>
      %c0_11 = arith.constant 0 : index
      %c0_12 = arith.constant 0 : index
      %13 = vector.load %arg5[%c0_11, %c0_12] : memref<512x128xf32, #tpu.memory_space<vmem>>, vector<512x128xf32>
      tpu.vector_store %arg5[%c0_11, %c0_12], %12 {strides = array<i32>} : memref<512x128xf32, #tpu.memory_space<vmem>>, vector<512x128xf32>,
    } else {
    }
    %c0 = arith.constant 0 : index
    %c0_1 = arith.constant 0 : index
    %3 = vector.load %arg5[%c0, %c0_1] : memref<512x128xf32, #tpu.memory_space<vmem>>, vector<512x128xf32>
    %c0_2 = arith.constant 0 : index
    %c0_3 = arith.constant 0 : index
    %4 = vector.load %arg2[%c0_2, %c0_3] : memref<512x128xbf16, #tpu.memory_space<vmem>>, vector<512x128xbf16>
    %c0_4 = arith.constant 0 : index
    %c0_5 = arith.constant 0 : index
    %5 = vector.load %arg3[%c0_4, %c0_5] : memref<128x128xbf16, #tpu.memory_space<vmem>>, vector<128x128xbf16>
    %cst = arith.constant dense<0.000000e+00> : vector<512x128xf32>
    %6 = tpu.matmul %4, %5, %cst {dimension_numbers = #tpu.dot_dimension_numbers<[1], [0], [0], [1], [0, 0, 1, 1], [], []>} : vector<512x128xbf16>, vector<128x128xbf16>, vector<512x128xf32> -> vector<512x128xf32>
    %7 = arith.addf %3, %6 : vector<512x128xf32>
    %c0_6 = arith.constant 0 : index
    %c0_7 = arith.constant 0 : index
    %8 = vector.load %arg5[%c0_6, %c0_7] : memref<512x128xf32, #tpu.memory_space<vmem>>, vector<512x128xf32>
    tpu.vector_store %arg5[%c0_6, %c0_7], %7 {strides = array<i32>} : memref<512x128xf32, #tpu.memory_space<vmem>>, vector<512x128xf32>,
    %c0_i32_8 = arith.constant 0 : i32
    %9 = arith.cmpi eq, %arg1, %c0_i32_8 : i32
    %10 = arith.extui %9 : i1 to i32
    %c0_i32_9 = arith.constant 0 : i32
    %11 = arith.cmpi ne, %10, %c0_i32_9 : i32
    scf.if %11 {
      %c0_10 = arith.constant 0 : index
      %c0_11 = arith.constant 0 : index
      %12 = vector.load %arg5[%c0_10, %c0_11] : memref<512x128xf32, #tpu.memory_space<vmem>>, vector<512x128xf32>
      %cst_12 = arith.constant 0.000000e+00 : f32
      %13 = vector.broadcast %cst_12 : f32 to vector<512x128xf32>
      %14 = arith.cmpf oge, %12, %13 : vector<512x128xf32>
      %cst_13 = arith.constant 2.000000e-01 : f32
      %15 = vector.broadcast %cst_13 : f32 to vector<512x128xf32>
      %16 = arith.mulf %15, %12 : vector<512x128xf32>
      %17 = arith.select %14, %12, %16 : vector<512x128xi1>, vector<512x128xf32>
      %18 = arith.truncf %17 : vector<512x128xf32> to vector<512x128xbf16>
      %c0_14 = arith.constant 0 : index
      %c0_15 = arith.constant 0 : index
      %19 = vector.load %arg4[%c0_14, %c0_15] : memref<512x128xbf16, #tpu.memory_space<vmem>>, vector<512x128xbf16>
      tpu.vector_store %arg4[%c0_14, %c0_15], %18 {strides = array<i32>} : memref<512x128xbf16, #tpu.memory_space<vmem>>, vector<512x128xbf16>,
    } else {
    }
    return
  }
  func.func @transform_0(%arg0: i32, %arg1: i32) -> (i32, i32) {
    %c0_i32 = arith.constant 0 : i32
    return %arg0, %arg1 : i32, i32
  }
  func.func @transform_1(%arg0: i32, %arg1: i32) -> (i32, i32) {
    %c0_i32 = arith.constant 0 : i32
    %c0_i32_0 = arith.constant 0 : i32
    return %arg1, %c0_i32 : i32, i32
  }
  func.func @transform_2(%arg0: i32, %arg1: i32) -> (i32, i32) {
    %c0_i32 = arith.constant 0 : i32
    %c0_i32_0 = arith.constant 0 : i32
    return %arg0, %c0_i32 : i32, i32
  }
}

</mosaic_0001>

<bundles_post_ra>
// kernel: tpu_custom_call.1
= control target key start
LH: loop header
LB: loop body
LE: loop exit
PB: predicated region body
PF: predicated region fallthrough
CT: control target
= control target key end

     0   :  { %7 = vsyncpa [#allocation4], 0  ;;  %s2865_s0 = inlined_call_operand.hbm [shape: bf16[8192,128], index: 0, kind: input, shape index: {}]   ;;  %s2866_s1 = inlined_call_operand.hbm [shape: bf16[128,128], index: 1, kind: input, shape index: {}]   ;;  %s2867_s2 = inlined_call_operand.hbm [shape: bf16[8192,128], index: 2, kind: output, shape index: {}]  }
   0x1   :  { %9 = vsyncpa [#allocation4 + $0x1], 0 }
   0x2   :  { %10 = vsyncpa [#allocation7], 0 }
   0x3   :  { %11 = vsyncpa [#allocation5], 0 }
   0x4   :  { %13 = vsyncpa [#allocation5 + $0x1], 0  ;;  %s2560_s9 = smov 0   ;;  %s2562_s10 = smov 0  }
   0x5   :  { %s2564_s11 = smov 0   ;;  %s2566_s12 = smov 0  }
   0x6   :  { %s2568_s13 = smov 0   ;;  %s2570_s14 = smov 0  }
   0x7 LB: > { %s1761_s15 = sadd.s32 4294967295, %s2536_s14   ;;  %s1762_s16 = sadd.s32 4294967294, %s2536_s14   ;;  %s2536_s14 = sphi %s2570_s14, %s19_s14   ;;  %s2532_s13 = sphi %s2568_s13, %s2890_s13   ;;  %s2528_s12 = sphi %s2566_s12, %s2889_s12   ;;  %s2524_s11 = sphi %s2564_s11, %s2888_s11   ;;  %s2520_s10 = sphi %s2562_s10, %s2887_s10   ;;  %s2516_s9 = sphi %s2560_s9, %s2886_s9  }
   0x8   : > { %p53_p0 = scmp.ne.s32.totalorder %s2520_s10, %s2516_s9  ;;  %p2594_p1 = scmp.eq.s32.totalorder %s1761_s15, 0 }
   0x9   : > { %p2598_p2 = scmp.eq.s32.totalorder %s1761_s15, 15  ;;  %p109_p3 = scmp.eq.s32.totalorder %s1762_s16, 15 }
   0xa   : > { %s2872_s17 = scalar_select %p2594_p1, 1, 0 }
   0xb   : > { %s2873_s18 = scalar_select %p2598_p2, 1, 0 }
   0xc   : > { %p2604_p4 = por %p2594_p1, %p53_p0  ;;  %p1763_p5 = scmp.ge.s32.totalorder %s2536_s14, 1 }
   0xd   : > { %p2609_p6 = por %p109_p3, %p53_p0  ;;  %p116_p7 = scmp.lt.s32.totalorder %s2536_s14, 17 }
   0xe   : > { %s2874_s19 = scalar_select %p2604_p4, 1, 0 }
   0xf   : > { %s2875_s20 = scalar_select %p2609_p6, 1, 0 }
  0x10   : > { %p2614_p8 = pnand %p1763_p5, %p116_p7  ;;  %s2538_s22 = smov [#allocation6]  }
  0x11   : > { %s131_s23 = sshll.u32 %s2538_s22, 4  ;;  %s31_s25 = sadd.s32 1, %s2532_s13  ;;  %s132_s23 = int_to_ptr.vmem [resolvable:$true] %s131_s23 }
  0x12   : > { %s2876_s21 = scalar_select %p2614_p8, 1, 0 }
  0x13   : > { %p2283_p9 = pneg %p2614_p8  ;;  %s2392_s28 = scalar_lea.hbm %s2866_s1, 1024 }
  0x14   : > { %p2393_p11 = scmp.ne.s32.totalorder %s2866_s1, %s2392_s28  ;;  %p2399_p3 = scmp.lt.u32.totalorder %s2392_s28, %s2866_s1 }
  0x15   : > { %p2622_p10 = pnand %p2283_p9, %p2594_p1 }
  0x17   : > { %p2394_p12 = pneg %p2622_p10 }
  0x19   : > { %p2395_p13 = pnand %p2394_p12, %p2393_p11 }
  0x1b   : > { %p2396_p0 = pneg %p2395_p13 }
  0x1d   : > { %p2401_p5 = pnand %p2399_p3, %p2396_p0 }
  0x1f   : > { %2404 = shalt.err (!%p2401_p5)
}
  0x20   : > { %s2405_s5 = scalar_lea.vmem %s132_s23, 1024  ;;  %p2413_p1 = scmp.lt.s32.totalorder %s132_s23, %s132_s23 }
  0x21   : > { %p2406_p7 = scmp.ne.s32.totalorder %s132_s23, %s2405_s5  ;;  %p2414_p4 = scmp.lt.s32.totalorder %s2405_s5, %s2405_s5 }
  0x23   : > { %p2408_p9 = pnand %p2406_p7, %p2394_p12  ;;  %p2415_p8 = por %p2414_p4, %p2413_p1 }
  0x25   : > { %p2409_p6 = pneg %p2408_p9 }
  0x27   : > { %p2416_p2 = pnand %p2415_p8, %p2409_p6 }
  0x29   : > { %2419 = shalt.err (!%p2416_p2)
}
  0x2a   : > { %s2539_s6 = smov 64   ;;  %s2540_s7 = smov 4  }
  0x2b   : > { %2286 = dma.hbm_to_vmem [thread:$0]  (!%p2622_p10), %s2866_s1, 1024, %s132_s23, [#allocation7], %s2539_s6, %s2539_s6, %s2540_s7  }
  0x2c   : > { %p33_p1 = scmp.ge.s32.totalorder %s31_s25, 16  ;;  %s40_s16 = sadd.s32 1, %s2524_s11 }
  0x2d   : > { %p47_p2 = scmp.ne.s32.totalorder %s2524_s11, %s2520_s10  ;;  %p48_p4 = scmp.eq.s32.totalorder %s2536_s14, 0 }
  0x2e   : > { %s2892_s25 = smov (%p33_p1, %s31_s25), 0  ;;  %p2879_p8 = scmp.ne.s32.totalorder %s2873_s18, 0 }
  0x2f   : > { %p2652_p6 = por %p48_p4, %p47_p2  ;;  %s35_s26 = ssub.s32 %s2532_s13, %s2892_s25 }
  0x30   : > { %p2658_p11 = por %p2879_p8, %p47_p2  ;;  %p2296_p12 = scmp.lt.s32.totalorder %s2536_s14, 16 }
  0x31   : > { %p38_p10 = scmp.eq.s32.totalorder %s35_s26, 0  ;;  %s145_s23 = sand.u32 1, %s2524_s11  }
  0x32   : > { %s1766_s27 = sshll.u32 %s145_s23, 8  ;;  %s1882_s29 = sshll.u32 %s2532_s13, 12 }
  0x33   : > { %s2667_s28 = scalar_select %p38_p10, %s2524_s11, %s40_s16  }
  0x34   : > { %s2673_s4 = scalar_lea.hbm %s2865_s0, %s1882_s29  ;;  %s149_s18 = scalar_lea.vmem [#allocation3], %s1766_s27 }
  0x35   : > { %s157_s5 = sshll.u32 %s149_s18, 4  ;;  %p2679_p13 = pnand %p2296_p12, %p2652_p6  ;;  %s2675_s5 = int_to_ptr.vmem [resolvable:$true] %s157_s5 }
  0x36   : > { %s2683_s15 = scalar_lea.sflag [#allocation4], %s145_s23  ;;  %s2420_s16 = scalar_lea.hbm %s2673_s4, 4096 }
  0x37   : > { %p2421_p0 = scmp.ne.s32.totalorder %s2673_s4, %s2420_s16  ;;  %p2422_p3 = pneg %p2679_p13 }
  0x38   : > { %s2425_s22 = scalar_lea.hbm %s2865_s0, 65536  ;;  %p2426_p9 = scmp.lt.u32.totalorder %s2673_s4, %s2865_s0 }
  0x39   : > { %p2423_p5 = pnand %p2422_p3, %p2421_p0  ;;  %p2427_p1 = scmp.lt.u32.totalorder %s2425_s22, %s2420_s16 }
  0x3a   : > { %p2429_p4 = scmp.lt.u32.totalorder %s2420_s16, %s2673_s4 }
  0x3b   : > { %p2424_p7 = pneg %p2423_p5  ;;  %p2428_p2 = por %p2427_p1, %p2426_p9 }
  0x3d   : > { %p2430_p6 = por %p2429_p4, %p2428_p2 }
  0x3f   : > { %p2431_p8 = pnand %p2430_p6, %p2424_p7 }
  0x41   : > { %2434 = shalt.err (!%p2431_p8)
}
  0x42   : > { %s2435_s23 = scalar_lea.vmem %s2675_s5, 4096  ;;  %s2541_s3 = smov [#allocation3]  }
  0x43   : > { %p2436_p12 = scmp.ne.s32.totalorder %s2675_s5, %s2435_s23  ;;  %s2440_s18 = sshll.u32 %s2541_s3, 4  ;;  %s2441_s18 = int_to_ptr.vmem [resolvable:$false] %s2440_s18 }
  0x44   : > { %s2442_s26 = scalar_lea.vmem %s2441_s18, 8192  ;;  %p2443_p5 = scmp.lt.s32.totalorder %s2675_s5, %s2441_s18 }
  0x45   : > { %p2438_p10 = pnand %p2436_p12, %p2422_p3  ;;  %p2444_p9 = scmp.lt.s32.totalorder %s2442_s26, %s2435_s23 }
  0x47   : > { %p2439_p0 = pneg %p2438_p10  ;;  %p2445_p1 = por %p2444_p9, %p2443_p5 }
  0x49   : > { %p2446_p2 = pnand %p2445_p1, %p2439_p0 }
  0x4b   : > { %2449 = shalt.err (!%p2446_p2)
}
  0x4c   : > { %2290 = dma.hbm_to_vmem [thread:$0]  (!%p2679_p13), %s2673_s4, 4096, %s2675_s5, %s2683_s15, %s2539_s6, %s2539_s6, %s2540_s7  }
  0x4d   : > { %p2882_p3 = scmp.ne.s32.totalorder %s2876_s21, 0 }
  0x4e   : > { %s2717_s16 = sand.u32 (!%p2882_p3), 1, %s2520_s10   ;;  %p2883_p7 = scmp.ne.s32.totalorder (!%p2882_p3), %s2874_s19, 0 }
  0x4f   : > { %169 = sbr.rel (%p2882_p3) target bundleno = 416 (0x1a0), region = 28  ;;  %s1770_s27 = sshll.u32 (!%p2882_p3), %s2717_s16, 8 }
  0x50   : > { %s172_s22 = scalar_lea.sflag (!%p2882_p3), [#allocation4], %s2717_s16  ;;  %s2723_s8 = scalar_lea.vmem (!%p2882_p3), [#allocation3], %s1770_s27 }
  0x56   : > { %2503 = dma.done.wait (%p2883_p7), %s172_s22, 4096  }
  0x57   : > { %2505 = vsyncadd (%p2883_p7), %s172_s22, 4294963200  ;;  %p2884_p13 = scmp.ne.s32.totalorder %s2872_s17, 0 }
  0x59   : > { %2507 = dma.done.wait (%p2884_p13), [#allocation7], 1024  }
  0x5a   : > { %2509 = vsyncadd (%p2884_p13), [#allocation7], 4294966272  ;;  %v2352_v0 = vld [vmem:[#allocation6] sm:$0xff]   ;;  %v2353_v1 = vld [vmem:[#allocation6 + $0x8] sm:$0xff]   ;;  %s2767_s17 = scalar_lea.vmem [#allocation8], %s1770_s27  ;;  %s1947_s19 = sshll.u32 %s2528_s12, 12 }
  0x5b   : > { %2179 = vmatprep.subr.bf16.mxu0 %v2352_v0  ;;  %2259 = vmatprep.subr.bf16.mxu1 %v2352_v0  ;;  %v2354_v2 = vld [vmem:[#allocation6 + $0x10] sm:$0xff]   ;;  %v2355_v3 = vld [vmem:[#allocation6 + $0x18] sm:$0xff]   ;;  %v2360_v4 = vld [vmem:[%s2723_s8] sm:$0xff]   ;;  %s1666_s21 = sshll.u32 %s2767_s17, 4  ;;  %s2811_s4 = scalar_lea.hbm %s2867_s2, %s1947_s19  ;;  %s2813_s21 = int_to_ptr.vmem [resolvable:$true] %s1666_s21 }
  0x5c   : > { %2180 = vmatpush3.bf16.msra.mxu0 %v2352_v0  ;;  %2267 = vmatpush3.bf16.msra.mxu1 %v2352_v0  ;;  %v2361_v5 = vld [vmem:[%s2723_s8 + $0x80] sm:$0xff]   ;;  %v2357_v7 = vld [vmem:[#allocation6 + $0x28] sm:$0xff]   ;;  %v2358_v8 = vld [vmem:[#allocation6 + $0x30] sm:$0xff]   ;;  %s1653_s5 = scalar_lea.sflag [#allocation5], %s2717_s16  ;;  %s2450_s15 = scalar_lea.vmem %s2813_s21, 4096 }
  0x5d   : > { %2181 = vmatprep.subr.bf16.mxu0 %v2353_v1  ;;  %2260 = vmatprep.subr.bf16.mxu1 %v2353_v1  ;;  %v2356_v6 = vld [vmem:[#allocation6 + $0x20] sm:$0xff]   ;;  %v2359_v9 = vld [vmem:[#allocation6 + $0x38] sm:$0xff]   ;;  %v2362_v10 = vld [vmem:[%s2723_s8 + $0x8] sm:$0xff]   ;;  %p2451_p4 = scmp.ne.s32.totalorder %s2813_s21, %s2450_s15  ;;  %s2542_s12 = smov [#allocation8]  }
  0x5e   : > { %2195 = vmatprep.mubr.bf16.mxu0 %v2360_v4  ;;  %2227 = vmatprep.mubr.bf16.mxu1 %v2361_v5  ;;  %v2363_v11 = vld [vmem:[%s2723_s8 + $0x88] sm:$0xff]   ;;  %v2364_v12 = vld [vmem:[%s2723_s8 + $0x10] sm:$0xff]   ;;  %v2366_v14 = vld [vmem:[%s2723_s8 + $0x18] sm:$0xff]   ;;  %s2454_s29 = sshll.u32 %s2542_s12, 4  ;;  %s2455_s29 = int_to_ptr.vmem [resolvable:$false] %s2454_s29 }
  0x5f   : > { %v2365_v13 = vld [vmem:[%s2723_s8 + $0x90] sm:$0xff]   ;;  %v2367_v15 = vld [vmem:[%s2723_s8 + $0x98] sm:$0xff]   ;;  %v2368_v16 = vld [vmem:[%s2723_s8 + $0x20] sm:$0xff]   ;;  %p2452_p6 = pnand %p2451_p4, %p2658_p11  ;;  %s2456_s30 = scalar_lea.vmem %s2455_s29, 8192 }
  0x60   : > { %2182 = vmatpush3.bf16.msra.mxu0 %v2353_v1  ;;  %2268 = vmatpush3.bf16.msra.mxu1 %v2353_v1  ;;  %v2369_v17 = vld [vmem:[%s2723_s8 + $0xa0] sm:$0xff]   ;;  %v2370_v18 = vld [vmem:[%s2723_s8 + $0x28] sm:$0xff]   ;;  %v2372_v20 = vld [vmem:[%s2723_s8 + $0x30] sm:$0xff]   ;;  %p2457_p12 = scmp.lt.s32.totalorder %s2813_s21, %s2455_s29  ;;  %p2458_p10 = scmp.lt.s32.totalorder %s2456_s30, %s2450_s15 }
  0x61   : > { %2183 = vmatprep.subr.bf16.mxu0 %v2354_v2  ;;  %2261 = vmatprep.subr.bf16.mxu1 %v2354_v2  ;;  %v2371_v19 = vld [vmem:[%s2723_s8 + $0xa8] sm:$0xff]   ;;  %v2373_v21 = vld [vmem:[%s2723_s8 + $0xb0] sm:$0xff]   ;;  %v2374_v22 = vld [vmem:[%s2723_s8 + $0x38] sm:$0xff]   ;;  %p2453_p8 = pneg %p2452_p6 }
  0x62   : > { %v2375_v23 = vld [vmem:[%s2723_s8 + $0xb8] sm:$0xff]   ;;  %v2376_v24 = vld [vmem:[%s2723_s8 + $0x40] sm:$0xff]   ;;  %v2378_v26 = vld [vmem:[%s2723_s8 + $0x48] sm:$0xff]   ;;  %p2459_p0 = por %p2458_p10, %p2457_p12 }
  0x63   : > { %v2377_v25 = vld [vmem:[%s2723_s8 + $0xc0] sm:$0xff]   ;;  %v2379_v27 = vld [vmem:[%s2723_s8 + $0xc8] sm:$0xff]   ;;  %v2380_v28 = vld [vmem:[%s2723_s8 + $0x50] sm:$0xff]  }
  0x64   : > { %2184 = vmatpush3.bf16.msra.mxu0 %v2354_v2  ;;  %2269 = vmatpush3.bf16.msra.mxu1 %v2354_v2  ;;  %v2381_v29 = vld [vmem:[%s2723_s8 + $0xd0] sm:$0xff]   ;;  %v2382_v30 = vld [vmem:[%s2723_s8 + $0x58] sm:$0xff]   ;;  %v2384_v32 = vld [vmem:[%s2723_s8 + $0x60] sm:$0xff]   ;;  %p2460_p5 = pnand %p2459_p0, %p2453_p8 }
  0x65   : > { %2185 = vmatprep.subr.bf16.mxu0 %v2355_v3  ;;  %2262 = vmatprep.subr.bf16.mxu1 %v2355_v3  ;;  %v2383_v31 = vld [vmem:[%s2723_s8 + $0xd8] sm:$0xff]   ;;  %v2385_v33 = vld [vmem:[%s2723_s8 + $0xe0] sm:$0xff]   ;;  %v2386_v34 = vld [vmem:[%s2723_s8 + $0x68] sm:$0xff]  }
  0x66   : > { %v2387_v35 = vld [vmem:[%s2723_s8 + $0xe8] sm:$0xff]   ;;  %v2388_v36 = vld [vmem:[%s2723_s8 + $0x70] sm:$0xff]   ;;  %v2390_v38 = vld [vmem:[%s2723_s8 + $0x78] sm:$0xff]  }
  0x67   : > { %v2389_v37 = vld [vmem:[%s2723_s8 + $0xf0] sm:$0xff]   ;;  %v2391_v39 = vld [vmem:[%s2723_s8 + $0xf8] sm:$0xff]  }
  0x68   : > { %2186 = vmatpush3.bf16.msra.mxu0 %v2355_v3  ;;  %2270 = vmatpush3.bf16.msra.mxu1 %v2355_v3 }
  0x69   : > { %2187 = vmatprep.subr.bf16.mxu0 %v2356_v6  ;;  %2263 = vmatprep.subr.bf16.mxu1 %v2356_v6 }
  0x6c   : > { %2188 = vmatpush3.bf16.msra.mxu0 %v2356_v6  ;;  %2271 = vmatpush3.bf16.msra.mxu1 %v2356_v6 }
  0x6d   : > { %2189 = vmatprep.subr.bf16.mxu0 %v2357_v7  ;;  %2264 = vmatprep.subr.bf16.mxu1 %v2357_v7 }
  0x70   : > { %2190 = vmatpush3.bf16.msra.mxu0 %v2357_v7  ;;  %2272 = vmatpush3.bf16.msra.mxu1 %v2357_v7 }
  0x71   : > { %2191 = vmatprep.subr.bf16.mxu0 %v2358_v8  ;;  %2265 = vmatprep.subr.bf16.mxu1 %v2358_v8 }
  0x74   : > { %2192 = vmatpush3.bf16.msra.mxu0 %v2358_v8  ;;  %2273 = vmatpush3.bf16.msra.mxu1 %v2358_v8 }
  0x75   : > { %2193 = vmatprep.subr.bf16.mxu0 %v2359_v9  ;;  %2266 = vmatprep.subr.bf16.mxu1 %v2359_v9 }
  0x78   : > { %2194 = vmatpush3.bf16.msra.mxu0 %v2359_v9  ;;  %2274 = vmatpush3.bf16.msra.mxu1 %v2359_v9 }
  0x7b   : > { %2196 = vmatmul.mubr.bf16.vlgmr.msra.gmra.mrb[0].mxu0 %v2362_v10  ;;  %2228 = vmatmul.mubr.bf16.vlgmr.msra.gmra.mrb[0].mxu1 %v2363_v11 }
  0x7c   : > { %2199 = vmatprep.mubr.bf16.mxu0 %v2364_v12  ;;  %2231 = vmatprep.mubr.bf16.mxu1 %v2365_v13 }
  0x83   : > { %2200 = vmatmul.mubr.bf16.gmra.mrb[4].mxu0 %v2366_v14  ;;  %2232 = vmatmul.mubr.bf16.gmra.mrb[4].mxu1 %v2367_v15 }
  0x84   : > { %2203 = vmatprep.mubr.bf16.mxu0 %v2368_v16  ;;  %2235 = vmatprep.mubr.bf16.mxu1 %v2369_v17 }
  0x8b   : > { %2204 = vmatmul.mubr.bf16.gmra.mrb[8].mxu0 %v2370_v18  ;;  %2236 = vmatmul.mubr.bf16.gmra.mrb[8].mxu1 %v2371_v19 }
  0x8c   : > { %2207 = vmatprep.mubr.bf16.mxu0 %v2372_v20  ;;  %2239 = vmatprep.mubr.bf16.mxu1 %v2373_v21 }
  0x93   : > { %2208 = vmatmul.mubr.bf16.gmra.mrb[12].mxu0 %v2374_v22  ;;  %2240 = vmatmul.mubr.bf16.gmra.mrb[12].mxu1 %v2375_v23 }
  0x94   : > { %2211 = vmatprep.mubr.bf16.mxu0 %v2376_v24  ;;  %2243 = vmatprep.mubr.bf16.mxu1 %v2377_v25 }
  0x9b   : > { %2212 = vmatmul.mubr.bf16.gmra.mrb[16].mxu0 %v2378_v26  ;;  %2244 = vmatmul.mubr.bf16.gmra.mrb[16].mxu1 %v2379_v27 }
  0x9c   : > { %2215 = vmatprep.mubr.bf16.mxu0 %v2380_v28  ;;  %2247 = vmatprep.mubr.bf16.mxu1 %v2381_v29 }
  0xa3   : > { %2216 = vmatmul.mubr.bf16.gmra.mrb[20].mxu0 %v2382_v30  ;;  %2248 = vmatmul.mubr.bf16.gmra.mrb[20].mxu1 %v2383_v31 }
  0xa4   : > { %2219 = vmatprep.mubr.bf16.mxu0 %v2384_v32  ;;  %2251 = vmatprep.mubr.bf16.mxu1 %v2385_v33 }
  0xab   : > { %2220 = vmatmul.mubr.bf16.gmra.mrb[24].mxu0 %v2386_v34  ;;  %2252 = vmatmul.mubr.bf16.gmra.mrb[24].mxu1 %v2387_v35 }
  0xac   : > { %2223 = vmatprep.mubr.bf16.mxu0 %v2388_v36  ;;  %2255 = vmatprep.mubr.bf16.mxu1 %v2389_v37 }
  0xb3   : > { %2224 = vmatmul.mubr.bf16.gmra.mrb[28].mxu0 %v2390_v38  ;;  %2256 = vmatmul.mubr.bf16.gmra.mrb[28].mxu1 %v2391_v39 }
 0x14e   : > { %v2197_v40 = vpop.f32.mrb[0].mxu0  ;;  %v2229_v41 = vpop.f32.mrb[0].mxu1 }
 0x14f   : > { %vm1142_vm0 = vcmp.ge.f32.partialorder %v2197_v40, 0.0  ;;  %v1206_v42 = vmul.f32 0.2, %v2197_v40  ;;  %v1238_v43 = vmul.f32 0.2, %v2229_v41  ;;  %vm1174_vm1 = vcmp.ge.f32.partialorder %v2229_v41, 0.0 }
 0x150   : > { %v690_v44 = vpop.f32.mrb[1].mxu0  ;;  %v818_v45 = vpop.f32.mrb[1].mxu1 }
 0x151   : > { %v1204_v46 = vmul.f32 0.2, %v690_v44  ;;  %v2198_v47 = vpop.f32.mrb[2].mxu0  ;;  %v2230_v48 = vpop.f32.mrb[2].mxu1  ;;  %v1270_v49 = vsel %vm1142_vm0, %v2197_v40, %v1206_v42  ;;  %v1236_v50 = vmul.f32 0.2, %v818_v45  ;;  %v1302_v52 = vsel %vm1174_vm1, %v2229_v41, %v1238_v43 }
 0x152   : > { %vm1143_vm2 = vcmp.ge.f32.partialorder %v2198_v47, 0.0  ;;  %v1207_v51 = vmul.f32 0.2, %v2198_v47  ;;  %vm1140_vm3 = vcmp.ge.f32.partialorder %v690_v44, 0.0  ;;  %vm1175_vm4 = vcmp.ge.f32.partialorder %v2230_v48, 0.0  ;;  %v693_v54 = vpop.f32.mrb[3].mxu0 }
 0x153   : > { %v1239_v53 = vmul.f32 0.2, %v2230_v48  ;;  %v821_v55 = vpop.f32.mrb[3].mxu1  ;;  %vm1172_vm5 = vcmp.ge.f32.partialorder %v818_v45, 0.0  ;;  %vm1141_vm6 = vcmp.ge.f32.partialorder %v693_v54, 0.0  ;;  %v1268_v61 = vsel %vm1140_vm3, %v690_v44, %v1204_v46 }
 0x154   : > { %v1271_v56 = vsel %vm1143_vm2, %v2198_v47, %v1207_v51  ;;  %v1205_v57 = vmul.f32 0.2, %v693_v54  ;;  %vm1173_vm7 = vcmp.ge.f32.partialorder %v821_v55, 0.0  ;;  %v1237_v60 = vmul.f32 0.2, %v821_v55 }
 0x155   : > { %v1956_v58 = vpack.c.bf16 %v1271_v56, %v1270_v49  ;;  %v1303_v59 = vsel %vm1175_vm4, %v2230_v48, %v1239_v53  ;;  %v1300_v2 = vsel %vm1172_vm5, %v818_v45, %v1236_v50 }
 0x156   : > { %v2036_v62 = vpack.c.bf16 %v1303_v59, %v1302_v52  ;;  %v1269_v63 = vsel %vm1141_vm6, %v693_v54, %v1205_v57  ;;  %v2201_v0 = vpop.f32.mrb[4].mxu0  ;;  %v2233_v1 = vpop.f32.mrb[4].mxu1  ;;  %v1301_v4 = vsel %vm1173_vm7, %v821_v55, %v1237_v60 }
 0x157   : > { %2108 = vst [vmem:[%s2767_s17 + $0x8] sm:$0xff] %v1956_v58   ;;  %v1951_v3 = vpack.c.bf16 %v1269_v63, %v1268_v61  ;;  %v1210_v5 = vmul.f32 0.2, %v2201_v0  ;;  %v706_v6 = vpop.f32.mrb[5].mxu0  ;;  %v834_v7 = vpop.f32.mrb[5].mxu1  ;;  %v2031_v8 = vpack.c.bf16 %v1301_v4, %v1300_v2  ;;  %vm1146_vm8 = vcmp.ge.f32.partialorder %v2201_v0, 0.0 }
 0x158   : > { %2124 = vst [vmem:[%s2767_s17 + $0x88] sm:$0xff] %v2036_v62   ;;  %v1242_v9 = vmul.f32 0.2, %v2233_v1  ;;  %v2202_v10 = vpop.f32.mrb[6].mxu0  ;;  %v2234_v11 = vpop.f32.mrb[6].mxu1  ;;  %vm1178_vm9 = vcmp.ge.f32.partialorder %v2233_v1, 0.0 }
 0x159   : > { %1952 = vst [vmem:[%s2767_s17] sm:$0xff] %v1951_v3   ;;  %v1208_v12 = vmul.f32 0.2, %v706_v6  ;;  %v1240_v13 = vmul.f32 0.2, %v834_v7  ;;  %v709_v14 = vpop.f32.mrb[7].mxu0  ;;  %2123 = vst [vmem:[%s2767_s17 + $0x80] sm:$0xff] %v2031_v8   ;;  %v1274_v17 = vsel %vm1146_vm8, %v2201_v0, %v1210_v5 }
 0x15a   : > { %vm1144_vm10 = vcmp.ge.f32.partialorder %v706_v6, 0.0  ;;  %vm1147_vm11 = vcmp.ge.f32.partialorder %v2202_v10, 0.0  ;;  %v1211_v15 = vmul.f32 0.2, %v2202_v10  ;;  %vm1179_vm12 = vcmp.ge.f32.partialorder %v2234_v11, 0.0  ;;  %v837_v16 = vpop.f32.mrb[7].mxu1 }
 0x15b   : > { %vm1176_vm13 = vcmp.ge.f32.partialorder %v834_v7, 0.0  ;;  %v1243_v18 = vmul.f32 0.2, %v2234_v11  ;;  %vm1145_vm14 = vcmp.ge.f32.partialorder %v709_v14, 0.0  ;;  %v1209_v20 = vmul.f32 0.2, %v709_v14 }
 0x15c   : > { %v1275_v19 = vsel %vm1147_vm11, %v2202_v10, %v1211_v15  ;;  %vm1177_vm15 = vcmp.ge.f32.partialorder %v837_v16, 0.0  ;;  %v1241_v21 = vmul.f32 0.2, %v837_v16  ;;  %v1306_v22 = vsel %vm1178_vm9, %v2233_v1, %v1242_v9 }
 0x15d   : > { %v1272_v23 = vsel %vm1144_vm10, %v706_v6, %v1208_v12  ;;  %v1966_v24 = vpack.c.bf16 %v1275_v19, %v1274_v17  ;;  %v1307_v25 = vsel %vm1179_vm12, %v2234_v11, %v1243_v18  ;;  %v1304_v26 = vsel %vm1176_vm13, %v834_v7, %v1240_v13 }
 0x15e   : > { %v2046_v27 = vpack.c.bf16 %v1307_v25, %v1306_v22  ;;  %v1273_v28 = vsel %vm1145_vm14, %v709_v14, %v1209_v20  ;;  %v1305_v29 = vsel %vm1177_vm15, %v837_v16, %v1241_v21  ;;  %v2205_v30 = vpop.f32.mrb[8].mxu0  ;;  %v2237_v31 = vpop.f32.mrb[8].mxu1 }
 0x15f   : > { %2110 = vst [vmem:[%s2767_s17 + $0x18] sm:$0xff] %v1966_v24   ;;  %v1961_v32 = vpack.c.bf16 %v1273_v28, %v1272_v23  ;;  %v2041_v33 = vpack.c.bf16 %v1305_v29, %v1304_v26  ;;  %vm1150_vm0 = vcmp.ge.f32.partialorder %v2205_v30, 0.0  ;;  %v1214_v34 = vmul.f32 0.2, %v2205_v30  ;;  %v722_v35 = vpop.f32.mrb[9].mxu0  ;;  %v850_v36 = vpop.f32.mrb[9].mxu1 }
 0x160   : > { %2126 = vst [vmem:[%s2767_s17 + $0x98] sm:$0xff] %v2046_v27   ;;  %vm1182_vm1 = vcmp.ge.f32.partialorder %v2237_v31, 0.0  ;;  %v1246_v37 = vmul.f32 0.2, %v2237_v31  ;;  %v1212_v38 = vmul.f32 0.2, %v722_v35 }
 0x161   : > { %2109 = vst [vmem:[%s2767_s17 + $0x10] sm:$0xff] %v1961_v32   ;;  %2125 = vst [vmem:[%s2767_s17 + $0x90] sm:$0xff] %v2041_v33   ;;  %v1244_v39 = vmul.f32 0.2, %v850_v36  ;;  %v2206_v40 = vpop.f32.mrb[10].mxu0  ;;  %v2238_v41 = vpop.f32.mrb[10].mxu1  ;;  %v1278_v42 = vsel %vm1150_vm0, %v2205_v30, %v1214_v34 }
 0x162   : > { %vm1148_vm2 = vcmp.ge.f32.partialorder %v722_v35, 0.0  ;;  %vm1151_vm3 = vcmp.ge.f32.partialorder %v2206_v40, 0.0  ;;  %v1215_v43 = vmul.f32 0.2, %v2206_v40  ;;  %v725_v44 = vpop.f32.mrb[11].mxu0  ;;  %v853_v45 = vpop.f32.mrb[11].mxu1  ;;  %v1310_v50 = vsel %vm1182_vm1, %v2237_v31, %v1246_v37 }
 0x163   : > { %vm1180_vm4 = vcmp.ge.f32.partialorder %v850_v36, 0.0  ;;  %vm1183_vm5 = vcmp.ge.f32.partialorder %v2238_v41, 0.0  ;;  %v1247_v46 = vmul.f32 0.2, %v2238_v41  ;;  %vm1149_vm6 = vcmp.ge.f32.partialorder %v725_v44, 0.0 }
 0x164   : > { %v1279_v47 = vsel %vm1151_vm3, %v2206_v40, %v1215_v43  ;;  %v1213_v48 = vmul.f32 0.2, %v725_v44  ;;  %vm1181_vm7 = vcmp.ge.f32.partialorder %v853_v45, 0.0  ;;  %v1245_v49 = vmul.f32 0.2, %v853_v45 }
 0x165   : > { %v1276_v51 = vsel %vm1148_vm2, %v722_v35, %v1212_v38  ;;  %v1976_v52 = vpack.c.bf16 %v1279_v47, %v1278_v42  ;;  %v1311_v53 = vsel %vm1183_vm5, %v2238_v41, %v1247_v46  ;;  %v1308_v54 = vsel %vm1180_vm4, %v850_v36, %v1244_v39 }
 0x166   : > { %v2056_v55 = vpack.c.bf16 %v1311_v53, %v1310_v50  ;;  %v1277_v56 = vsel %vm1149_vm6, %v725_v44, %v1213_v48  ;;  %v1309_v57 = vsel %vm1181_vm7, %v853_v45, %v1245_v49  ;;  %v2209_v58 = vpop.f32.mrb[12].mxu0  ;;  %v2241_v59 = vpop.f32.mrb[12].mxu1 }
 0x167   : > { %2112 = vst [vmem:[%s2767_s17 + $0x28] sm:$0xff] %v1976_v52   ;;  %v1971_v60 = vpack.c.bf16 %v1277_v56, %v1276_v51  ;;  %v2051_v61 = vpack.c.bf16 %v1309_v57, %v1308_v54  ;;  %vm1154_vm8 = vcmp.ge.f32.partialorder %v2209_v58, 0.0  ;;  %v1218_v62 = vmul.f32 0.2, %v2209_v58  ;;  %v738_v63 = vpop.f32.mrb[13].mxu0  ;;  %v866_v0 = vpop.f32.mrb[13].mxu1 }
 0x168   : > { %2128 = vst [vmem:[%s2767_s17 + $0xa8] sm:$0xff] %v2056_v55   ;;  %vm1186_vm9 = vcmp.ge.f32.partialorder %v2241_v59, 0.0  ;;  %v1250_v1 = vmul.f32 0.2, %v2241_v59  ;;  %v1216_v2 = vmul.f32 0.2, %v738_v63 }
 0x169   : > { %2111 = vst [vmem:[%s2767_s17 + $0x20] sm:$0xff] %v1971_v60   ;;  %2127 = vst [vmem:[%s2767_s17 + $0xa0] sm:$0xff] %v2051_v61   ;;  %v1248_v3 = vmul.f32 0.2, %v866_v0  ;;  %v2210_v4 = vpop.f32.mrb[14].mxu0  ;;  %v2242_v5 = vpop.f32.mrb[14].mxu1  ;;  %v1282_v6 = vsel %vm1154_vm8, %v2209_v58, %v1218_v62 }
 0x16a   : > { %vm1152_vm10 = vcmp.ge.f32.partialorder %v738_v63, 0.0  ;;  %vm1155_vm11 = vcmp.ge.f32.partialorder %v2210_v4, 0.0  ;;  %v1219_v7 = vmul.f32 0.2, %v2210_v4  ;;  %v741_v8 = vpop.f32.mrb[15].mxu0  ;;  %v869_v9 = vpop.f32.mrb[15].mxu1  ;;  %v1314_v14 = vsel %vm1186_vm9, %v2241_v59, %v1250_v1 }
 0x16b   : > { %vm1184_vm12 = vcmp.ge.f32.partialorder %v866_v0, 0.0  ;;  %vm1187_vm13 = vcmp.ge.f32.partialorder %v2242_v5, 0.0  ;;  %v1251_v10 = vmul.f32 0.2, %v2242_v5  ;;  %vm1153_vm14 = vcmp.ge.f32.partialorder %v741_v8, 0.0 }
 0x16c   : > { %v1283_v11 = vsel %vm1155_vm11, %v2210_v4, %v1219_v7  ;;  %v1217_v12 = vmul.f32 0.2, %v741_v8  ;;  %vm1185_vm15 = vcmp.ge.f32.partialorder %v869_v9, 0.0  ;;  %v1249_v13 = vmul.f32 0.2, %v869_v9 }
 0x16d   : > { %v1280_v15 = vsel %vm1152_vm10, %v738_v63, %v1216_v2  ;;  %v1986_v16 = vpack.c.bf16 %v1283_v11, %v1282_v6  ;;  %v1315_v17 = vsel %vm1187_vm13, %v2242_v5, %v1251_v10  ;;  %v1312_v18 = vsel %vm1184_vm12, %v866_v0, %v1248_v3 }
 0x16e   : > { %v2066_v19 = vpack.c.bf16 %v1315_v17, %v1314_v14  ;;  %v1281_v20 = vsel %vm1153_vm14, %v741_v8, %v1217_v12  ;;  %v1313_v21 = vsel %vm1185_vm15, %v869_v9, %v1249_v13  ;;  %v2213_v22 = vpop.f32.mrb[16].mxu0  ;;  %v2245_v23 = vpop.f32.mrb[16].mxu1 }
 0x16f   : > { %2114 = vst [vmem:[%s2767_s17 + $0x38] sm:$0xff] %v1986_v16   ;;  %v1981_v24 = vpack.c.bf16 %v1281_v20, %v1280_v15  ;;  %v2061_v25 = vpack.c.bf16 %v1313_v21, %v1312_v18  ;;  %vm1158_vm0 = vcmp.ge.f32.partialorder %v2213_v22, 0.0  ;;  %v1222_v26 = vmul.f32 0.2, %v2213_v22  ;;  %v754_v27 = vpop.f32.mrb[17].mxu0  ;;  %v882_v28 = vpop.f32.mrb[17].mxu1 }
 0x170   : > { %2130 = vst [vmem:[%s2767_s17 + $0xb8] sm:$0xff] %v2066_v19   ;;  %vm1190_vm1 = vcmp.ge.f32.partialorder %v2245_v23, 0.0  ;;  %v1254_v29 = vmul.f32 0.2, %v2245_v23  ;;  %v1220_v30 = vmul.f32 0.2, %v754_v27 }
 0x171   : > { %2113 = vst [vmem:[%s2767_s17 + $0x30] sm:$0xff] %v1981_v24   ;;  %2129 = vst [vmem:[%s2767_s17 + $0xb0] sm:$0xff] %v2061_v25   ;;  %v1252_v31 = vmul.f32 0.2, %v882_v28  ;;  %v2214_v32 = vpop.f32.mrb[18].mxu0  ;;  %v2246_v33 = vpop.f32.mrb[18].mxu1  ;;  %v1286_v34 = vsel %vm1158_vm0, %v2213_v22, %v1222_v26 }
 0x172   : > { %vm1156_vm2 = vcmp.ge.f32.partialorder %v754_v27, 0.0  ;;  %vm1159_vm3 = vcmp.ge.f32.partialorder %v2214_v32, 0.0  ;;  %v1223_v35 = vmul.f32 0.2, %v2214_v32  ;;  %v757_v36 = vpop.f32.mrb[19].mxu0  ;;  %v885_v37 = vpop.f32.mrb[19].mxu1  ;;  %v1318_v42 = vsel %vm1190_vm1, %v2245_v23, %v1254_v29 }
 0x173   : > { %vm1188_vm4 = vcmp.ge.f32.partialorder %v882_v28, 0.0  ;;  %vm1191_vm5 = vcmp.ge.f32.partialorder %v2246_v33, 0.0  ;;  %v1255_v38 = vmul.f32 0.2, %v2246_v33  ;;  %vm1157_vm6 = vcmp.ge.f32.partialorder %v757_v36, 0.0 }
 0x174   : > { %v1287_v39 = vsel %vm1159_vm3, %v2214_v32, %v1223_v35  ;;  %v1221_v40 = vmul.f32 0.2, %v757_v36  ;;  %vm1189_vm7 = vcmp.ge.f32.partialorder %v885_v37, 0.0  ;;  %v1253_v41 = vmul.f32 0.2, %v885_v37 }
 0x175   : > { %v1284_v43 = vsel %vm1156_vm2, %v754_v27, %v1220_v30  ;;  %v1996_v44 = vpack.c.bf16 %v1287_v39, %v1286_v34  ;;  %v1319_v45 = vsel %vm1191_vm5, %v2246_v33, %v1255_v38  ;;  %v1316_v46 = vsel %vm1188_vm4, %v882_v28, %v1252_v31 }
 0x176   : > { %v2076_v47 = vpack.c.bf16 %v1319_v45, %v1318_v42  ;;  %v1285_v48 = vsel %vm1157_vm6, %v757_v36, %v1221_v40  ;;  %v1317_v49 = vsel %vm1189_vm7, %v885_v37, %v1253_v41  ;;  %v2217_v50 = vpop.f32.mrb[20].mxu0  ;;  %v2249_v51 = vpop.f32.mrb[20].mxu1 }
 0x177   : > { %2116 = vst [vmem:[%s2767_s17 + $0x48] sm:$0xff] %v1996_v44   ;;  %v1991_v52 = vpack.c.bf16 %v1285_v48, %v1284_v43  ;;  %v2071_v53 = vpack.c.bf16 %v1317_v49, %v1316_v46  ;;  %vm1162_vm8 = vcmp.ge.f32.partialorder %v2217_v50, 0.0  ;;  %v1226_v54 = vmul.f32 0.2, %v2217_v50  ;;  %v770_v55 = vpop.f32.mrb[21].mxu0  ;;  %v898_v56 = vpop.f32.mrb[21].mxu1 }
 0x178   : > { %2132 = vst [vmem:[%s2767_s17 + $0xc8] sm:$0xff] %v2076_v47   ;;  %vm1194_vm9 = vcmp.ge.f32.partialorder %v2249_v51, 0.0  ;;  %v1258_v57 = vmul.f32 0.2, %v2249_v51  ;;  %v1224_v58 = vmul.f32 0.2, %v770_v55 }
 0x179   : > { %2115 = vst [vmem:[%s2767_s17 + $0x40] sm:$0xff] %v1991_v52   ;;  %2131 = vst [vmem:[%s2767_s17 + $0xc0] sm:$0xff] %v2071_v53   ;;  %v1256_v59 = vmul.f32 0.2, %v898_v56  ;;  %v2218_v60 = vpop.f32.mrb[22].mxu0  ;;  %v2250_v61 = vpop.f32.mrb[22].mxu1  ;;  %v1290_v62 = vsel %vm1162_vm8, %v2217_v50, %v1226_v54 }
 0x17a   : > { %vm1160_vm10 = vcmp.ge.f32.partialorder %v770_v55, 0.0  ;;  %vm1163_vm11 = vcmp.ge.f32.partialorder %v2218_v60, 0.0  ;;  %v1227_v63 = vmul.f32 0.2, %v2218_v60  ;;  %v773_v0 = vpop.f32.mrb[23].mxu0  ;;  %v901_v1 = vpop.f32.mrb[23].mxu1  ;;  %v1322_v6 = vsel %vm1194_vm9, %v2249_v51, %v1258_v57 }
 0x17b   : > { %vm1192_vm12 = vcmp.ge.f32.partialorder %v898_v56, 0.0  ;;  %vm1195_vm13 = vcmp.ge.f32.partialorder %v2250_v61, 0.0  ;;  %v1259_v2 = vmul.f32 0.2, %v2250_v61  ;;  %vm1161_vm14 = vcmp.ge.f32.partialorder %v773_v0, 0.0 }
 0x17c   : > { %v1291_v3 = vsel %vm1163_vm11, %v2218_v60, %v1227_v63  ;;  %v1225_v4 = vmul.f32 0.2, %v773_v0  ;;  %vm1193_vm15 = vcmp.ge.f32.partialorder %v901_v1, 0.0  ;;  %v1257_v5 = vmul.f32 0.2, %v901_v1 }
 0x17d   : > { %v1288_v7 = vsel %vm1160_vm10, %v770_v55, %v1224_v58  ;;  %v2006_v8 = vpack.c.bf16 %v1291_v3, %v1290_v62  ;;  %v1323_v9 = vsel %vm1195_vm13, %v2250_v61, %v1259_v2  ;;  %v1320_v10 = vsel %vm1192_vm12, %v898_v56, %v1256_v59 }
 0x17e   : > { %v2086_v11 = vpack.c.bf16 %v1323_v9, %v1322_v6  ;;  %v1289_v12 = vsel %vm1161_vm14, %v773_v0, %v1225_v4  ;;  %v1321_v13 = vsel %vm1193_vm15, %v901_v1, %v1257_v5  ;;  %v2221_v14 = vpop.f32.mrb[24].mxu0  ;;  %v2253_v15 = vpop.f32.mrb[24].mxu1 }
 0x17f   : > { %2118 = vst [vmem:[%s2767_s17 + $0x58] sm:$0xff] %v2006_v8   ;;  %v2001_v16 = vpack.c.bf16 %v1289_v12, %v1288_v7  ;;  %v2081_v17 = vpack.c.bf16 %v1321_v13, %v1320_v10  ;;  %vm1166_vm0 = vcmp.ge.f32.partialorder %v2221_v14, 0.0  ;;  %v1230_v18 = vmul.f32 0.2, %v2221_v14  ;;  %v786_v19 = vpop.f32.mrb[25].mxu0  ;;  %v914_v20 = vpop.f32.mrb[25].mxu1 }
 0x180   : > { %2134 = vst [vmem:[%s2767_s17 + $0xd8] sm:$0xff] %v2086_v11   ;;  %vm1198_vm1 = vcmp.ge.f32.partialorder %v2253_v15, 0.0  ;;  %v1262_v21 = vmul.f32 0.2, %v2253_v15  ;;  %v1228_v22 = vmul.f32 0.2, %v786_v19 }
 0x181   : > { %2117 = vst [vmem:[%s2767_s17 + $0x50] sm:$0xff] %v2001_v16   ;;  %2133 = vst [vmem:[%s2767_s17 + $0xd0] sm:$0xff] %v2081_v17   ;;  %v1260_v23 = vmul.f32 0.2, %v914_v20  ;;  %v2222_v24 = vpop.f32.mrb[26].mxu0  ;;  %v2254_v25 = vpop.f32.mrb[26].mxu1  ;;  %v1294_v26 = vsel %vm1166_vm0, %v2221_v14, %v1230_v18 }
 0x182   : > { %vm1164_vm2 = vcmp.ge.f32.partialorder %v786_v19, 0.0  ;;  %vm1167_vm3 = vcmp.ge.f32.partialorder %v2222_v24, 0.0  ;;  %v1231_v27 = vmul.f32 0.2, %v2222_v24  ;;  %v789_v28 = vpop.f32.mrb[27].mxu0  ;;  %v917_v29 = vpop.f32.mrb[27].mxu1  ;;  %v1326_v34 = vsel %vm1198_vm1, %v2253_v15, %v1262_v21 }
 0x183   : > { %vm1196_vm4 = vcmp.ge.f32.partialorder %v914_v20, 0.0  ;;  %vm1199_vm5 = vcmp.ge.f32.partialorder %v2254_v25, 0.0  ;;  %v1263_v30 = vmul.f32 0.2, %v2254_v25  ;;  %vm1165_vm6 = vcmp.ge.f32.partialorder %v789_v28, 0.0 }
 0x184   : > { %v1295_v31 = vsel %vm1167_vm3, %v2222_v24, %v1231_v27  ;;  %v1229_v32 = vmul.f32 0.2, %v789_v28  ;;  %vm1197_vm7 = vcmp.ge.f32.partialorder %v917_v29, 0.0  ;;  %v1261_v33 = vmul.f32 0.2, %v917_v29 }
 0x185   : > { %v1292_v35 = vsel %vm1164_vm2, %v786_v19, %v1228_v22  ;;  %v2016_v36 = vpack.c.bf16 %v1295_v31, %v1294_v26  ;;  %v1327_v37 = vsel %vm1199_vm5, %v2254_v25, %v1263_v30  ;;  %v1324_v38 = vsel %vm1196_vm4, %v914_v20, %v1260_v23 }
 0x186   : > { %v2096_v39 = vpack.c.bf16 %v1327_v37, %v1326_v34  ;;  %v1293_v40 = vsel %vm1165_vm6, %v789_v28, %v1229_v32  ;;  %v1325_v41 = vsel %vm1197_vm7, %v917_v29, %v1261_v33  ;;  %v2225_v42 = vpop.f32.mrb[28].mxu0  ;;  %v2257_v43 = vpop.f32.mrb[28].mxu1 }
 0x187   : > { %2120 = vst [vmem:[%s2767_s17 + $0x68] sm:$0xff] %v2016_v36   ;;  %v2011_v44 = vpack.c.bf16 %v1293_v40, %v1292_v35  ;;  %v2091_v45 = vpack.c.bf16 %v1325_v41, %v1324_v38  ;;  %vm1170_vm8 = vcmp.ge.f32.partialorder %v2225_v42, 0.0  ;;  %v1234_v46 = vmul.f32 0.2, %v2225_v42  ;;  %v802_v47 = vpop.f32.mrb[29].mxu0  ;;  %v930_v48 = vpop.f32.mrb[29].mxu1 }
 0x188   : > { %2136 = vst [vmem:[%s2767_s17 + $0xe8] sm:$0xff] %v2096_v39   ;;  %vm1202_vm9 = vcmp.ge.f32.partialorder %v2257_v43, 0.0  ;;  %v1266_v49 = vmul.f32 0.2, %v2257_v43  ;;  %v1232_v50 = vmul.f32 0.2, %v802_v47 }
 0x189   : > { %2119 = vst [vmem:[%s2767_s17 + $0x60] sm:$0xff] %v2011_v44   ;;  %2135 = vst [vmem:[%s2767_s17 + $0xe0] sm:$0xff] %v2091_v45   ;;  %v1264_v51 = vmul.f32 0.2, %v930_v48  ;;  %v2226_v52 = vpop.f32.mrb[30].mxu0  ;;  %v2258_v53 = vpop.f32.mrb[30].mxu1  ;;  %v1298_v54 = vsel %vm1170_vm8, %v2225_v42, %v1234_v46 }
 0x18a   : > { %vm1168_vm10 = vcmp.ge.f32.partialorder %v802_v47, 0.0  ;;  %vm1171_vm11 = vcmp.ge.f32.partialorder %v2226_v52, 0.0  ;;  %v1235_v55 = vmul.f32 0.2, %v2226_v52  ;;  %v805_v56 = vpop.f32.mrb[31].mxu0  ;;  %v933_v57 = vpop.f32.mrb[31].mxu1  ;;  %v1330_v62 = vsel %vm1202_vm9, %v2257_v43, %v1266_v49 }
 0x18b   : > { %vm1200_vm12 = vcmp.ge.f32.partialorder %v930_v48, 0.0  ;;  %vm1203_vm13 = vcmp.ge.f32.partialorder %v2258_v53, 0.0  ;;  %v1267_v58 = vmul.f32 0.2, %v2258_v53  ;;  %vm1169_vm14 = vcmp.ge.f32.partialorder %v805_v56, 0.0 }
 0x18c   : > { %v1299_v59 = vsel %vm1171_vm11, %v2226_v52, %v1235_v55  ;;  %v1233_v60 = vmul.f32 0.2, %v805_v56  ;;  %vm1201_vm15 = vcmp.ge.f32.partialorder %v933_v57, 0.0  ;;  %v1265_v61 = vmul.f32 0.2, %v933_v57 }
 0x18d   : > { %v1296_v63 = vsel %vm1168_vm10, %v802_v47, %v1232_v50  ;;  %v2026_v0 = vpack.c.bf16 %v1299_v59, %v1298_v54  ;;  %v1331_v1 = vsel %vm1203_vm13, %v2258_v53, %v1267_v58  ;;  %v1328_v2 = vsel %vm1200_vm12, %v930_v48, %v1264_v51 }
 0x18e   : > { %v2106_v3 = vpack.c.bf16 %v1331_v1, %v1330_v62  ;;  %v1297_v4 = vsel %vm1169_vm14, %v805_v56, %v1233_v60  ;;  %v1329_v5 = vsel %vm1201_vm15, %v933_v57, %v1265_v61 }
 0x18f   : > { %2122 = vst [vmem:[%s2767_s17 + $0x78] sm:$0xff] %v2026_v0   ;;  %v2021_v6 = vpack.c.bf16 %v1297_v4, %v1296_v63  ;;  %v2101_v7 = vpack.c.bf16 %v1329_v5, %v1328_v2 }
 0x190   : > { %2138 = vst [vmem:[%s2767_s17 + $0xf8] sm:$0xff] %v2106_v3  }
 0x191   : > { %2121 = vst [vmem:[%s2767_s17 + $0x70] sm:$0xff] %v2021_v6   ;;  %2137 = vst [vmem:[%s2767_s17 + $0xf0] sm:$0xff] %v2101_v7  }
 0x192   : > { %2463 = shalt.err (!%p2460_p5)
}
 0x193   : > { %s2464_s23 = scalar_lea.hbm %s2811_s4, 4096  ;;  %s2468_s26 = scalar_lea.hbm %s2867_s2, 65536 }
 0x194   : > { %p2465_p9 = scmp.ne.s32.totalorder %s2811_s4, %s2464_s23  ;;  %p2469_p3 = scmp.lt.u32.totalorder %s2811_s4, %s2867_s2 }
 0x195   : > { %p2470_p7 = scmp.lt.u32.totalorder %s2468_s26, %s2464_s23  ;;  %p2472_p4 = scmp.lt.u32.totalorder %s2464_s23, %s2811_s4 }
 0x196   : > { %p2466_p1 = pnand %p2465_p9, %p2658_p11 }
 0x197   : > { %p2471_p13 = por %p2470_p7, %p2469_p3 }
 0x198   : > { %p2467_p2 = pneg %p2466_p1 }
 0x199   : > { %p2473_p6 = por %p2472_p4, %p2471_p13 }
 0x19b   : > { %p2474_p8 = pnand %p2473_p6, %p2467_p2 }
 0x19d   : > { %2477 = shalt.err (!%p2474_p8)
}
 0x19e   : > { %s2543_s8 = smov 64   ;;  %s2544_s17 = smov 4  }
 0x19f   : > { %2281 = dma.vmem_to_hbm [thread:$0]  (%p2658_p11), %s2813_s21, 4096, %s2811_s4, %s1653_s5, %s2543_s8, %s2543_s8, %s2544_s17  }
 0x1a0 PF: > { %p2298_p12 = scmp.ge.s32.totalorder %s2536_s14, 2  ;;  %s1681_s19 = sand.u32 1, %s2516_s9  }
 0x1a1   : > { %p2885_p10 = scmp.ne.s32.totalorder %s2875_s20, 0  ;;  %s1682_s6 = scalar_lea.sflag [#allocation5], %s1681_s19 }
 0x1a3   : > { %p2292_p0 = pnand %p2298_p12, %p2885_p10 }
 0x1a5   : > { %2511 = dma.done.wait (!%p2292_p0), %s1682_s6, 4096  }
 0x1a6   : > { %2513 = vsyncadd (!%p2292_p0), %s1682_s6, 4294963200  ;;  %s19_s14 = sadd.s32 1, %s2536_s14   ;;  %s2886_s9 = smov %s2520_s10 }
 0x1a7   : > { %p16_p5 = scmp.ge.s32.totalorder %s19_s14, 18   ;;  %s2887_s10 = smov %s2524_s11 }
 0x1a8   : > { %s2888_s11 = smov %s2667_s28  ;;  %s2889_s12 = smov %s2532_s13 }
 0x1a9   : > { %s2890_s13 = smov %s2892_s25  ;;  %18 = sbr.rel (!%p16_p5) target bundleno = 7 (0x7), region = 86 }
 0x1b0   :  { %1687 = vsyncpa [#allocation4], 1 }
 0x1b1   :  { %1689 = vsyncpa [#allocation4 + $0x1], 1 }
 0x1b2   :  { %1690 = vsyncpa [#allocation7], 1 }
 0x1b3   :  { %1691 = vsyncpa [#allocation5], 1 }
 0x1b4   :  { %1693 = vsyncpa [#allocation5 + $0x1], 1 }

</bundles_post_ra>
